<compile_context>
chip_gen: v7x
topology: tpu7x:2x2x1
jax: 0.10.0
libtpu: 0.0.40
codegen_flags: <defaults>
</compile_context>

<pallas_src>
import math

import jax
import jax.numpy as jnp
from jax.experimental import pallas as pl
from jax.experimental.pallas import tpu as pltpu


# -----------------------------------------------------------------------------
# Fused stack kernel: one grid step = one batch element through ALL layers.
#   refs = (x_ref, [wqkv, wo, w1, w2, vecs] * n_layers, out_ref, attn_refs...)
#     x_ref:    (1, S, D)
#     wqkv:     (D, 3D)     fused Q|K|V projection
#     vecs:     (6, max(D,Dff)) packed [b1, b2, g1, be1, g2, be2]
#     out_ref:  (1, total_len, D)   concatenated layer outputs
#     attn_l:   (1, S_l, SP_l)      SP_l = 128*ceil(S_l/128) (lane-dense)
# -----------------------------------------------------------------------------
def _make_stack_kernel(layer_lens, out_offsets, sp_widths, d_model, n_layers):
    def kernel(*refs):
        x_ref = refs[0]
        w_refs = refs[1:1 + 5 * n_layers]
        out_ref = refs[1 + 5 * n_layers]
        attn_refs = refs[2 + 5 * n_layers:]

        D = d_model
        prev = x_ref[0].astype(jnp.float32)                 # (S, D)

        for li in range(n_layers):                          # static unroll
            L = layer_lens[li]
            off = out_offsets[li]
            SP = sp_widths[li]
            wqkv_ref, wo_ref, w1_ref, w2_ref, vec_ref = w_refs[5 * li:5 * li + 5]
            Dff = w1_ref.shape[-1]

            vecs = vec_ref[...]                             # one packed load
            b1, b2 = vecs[0:1, :Dff], vecs[1:2, :D]
            g1, be1 = vecs[2:3, :D], vecs[3:4, :D]
            g2, be2 = vecs[4:5, :D], vecs[5:6, :D]

            # Static suffix slice == x[:, -inp_len:, :] of the reference.
            start = max(prev.shape[0] - L, 0)
            xin = prev[start:start + L, :]                  # (L, D)

            # ---- fused Q|K|V projection: single MXU push against (D, 3D) ---
            wqkv = wqkv_ref[...]
            qkv = jnp.dot(xin.astype(wqkv.dtype), wqkv,
                          preferred_element_type=jnp.float32)   # (L, 3D)
            q, k, v = qkv[:, :D], qkv[:, D:2 * D], qkv[:, 2 * D:]

            # ---- single-head attention (contract over D, no explicit k.T) --
            s = jax.lax.dot_general(q, k, (((1,), (1,)), ((), ())),
                                    preferred_element_type=jnp.float32)
            s = s * (1.0 / math.sqrt(D))
            s = s - jnp.max(s, axis=-1, keepdims=True)
            e = jnp.exp(s)
            # Exact normalization: attention rows sum to 1 (matches torch).
            p = e / jnp.sum(e, axis=-1, keepdims=True)

            ctx = jnp.dot(p, v, preferred_element_type=jnp.float32)
            wo = wo_ref[...]
            proj = jnp.dot(ctx.astype(wo.dtype), wo,
                           preferred_element_type=jnp.float32)

            # ---- residual + LayerNorm 1 ------------------------------------
            h = xin + proj
            mu = jnp.mean(h, axis=-1, keepdims=True)
            var = jnp.mean((h - mu) ** 2, axis=-1, keepdims=True)
            h = (h - mu) * jax.lax.rsqrt(var + 1e-5) * g1 + be1

            # ---- feed-forward ----------------------------------------------
            w1 = w1_ref[...]
            ff = jnp.dot(h.astype(w1.dtype), w1,
                         preferred_element_type=jnp.float32) + b1
            ff = jnp.maximum(ff, 0.0)
            w2 = w2_ref[...]
            ff = jnp.dot(ff.astype(w2.dtype), w2,
                         preferred_element_type=jnp.float32) + b2

            # ---- residual + LayerNorm 2 ------------------------------------
            o = h + ff
            mu2 = jnp.mean(o, axis=-1, keepdims=True)
            var2 = jnp.mean((o - mu2) ** 2, axis=-1, keepdims=True)
            o = (o - mu2) * jax.lax.rsqrt(var2 + 1e-5) * g2 + be2

            # In-kernel concatenation: write this layer's static slice.
            out_ref[0, off:off + L, :] = o.astype(out_ref.dtype)

            if attn_refs:                                   # lane-dense store
                if SP > L:
                    p = jnp.concatenate(
                        [p, jnp.zeros((L, SP - L), jnp.float32)], axis=-1)
                attn_refs[li][0] = p

            prev = o

    return kernel


# -----------------------------------------------------------------------------
# EncoderStack forward: ONE pallas_call for the whole stack.
# -----------------------------------------------------------------------------
def encoder_stack_forward(x, encoders_params, attention_mask=None,
                          weight_dtype=None, return_attention=True):
    """x: (B, S, D) -> (x_stack (B, sum(S_l), D), [attn_l (B, S_l, S_l)]).

    attention_mask is accepted but (as in the reference forward) never used.
    weight_dtype=jnp.bfloat16 halves weight DMA/VMEM bytes (recommended on
    v6e/v7x at realistic sizes); accumulation stays f32 either way.
    """
    del attention_mask
    B, S, D = x.shape

    # Static stack structure: per-layer suffix length and output offset.
    inp_len = S
    layer_lens, active = [], []
    for p in encoders_params:
        if p is None:
            inp_len //= 2
            continue
        layer_lens.append(inp_len)
        active.append(p)
        inp_len //= 2
    if not active:
        raise ValueError("EncoderStack needs at least one non-None encoder.")

    out_offsets, off = [], 0
    for L in layer_lens:
        out_offsets.append(off)
        off += L
    total_len = off
    sp_widths = [128 * pl.cdiv(L, 128) for L in layer_lens]
    n_layers = len(active)

    # ---- flatten inputs: x, then per layer (wqkv, wo, w1, w2, packed vecs) --
    flat_inputs = [x]
    in_specs = [pl.BlockSpec((1, S, D), lambda b: (b, 0, 0))]

    def _full_spec(shape):
        return pl.BlockSpec(shape, lambda b, _z=(0,) * len(shape): _z)

    for p in active:
        Dff = p["w1"].shape[-1]
        W = max(D, Dff)
        wqkv = jnp.concatenate([p["wq"], p["wk"], p["wv"]], axis=1)  # (D, 3D)
        wo, w1, w2 = p["wo"], p["w1"], p["w2"]
        if weight_dtype is not None:
            wqkv, wo, w1, w2 = (a.astype(weight_dtype)
                                for a in (wqkv, wo, w1, w2))

        def _row(v, n):
            return jnp.pad(jnp.reshape(v, (1, n)).astype(jnp.float32),
                           ((0, 0), (0, W - n)))

        vecs = jnp.concatenate(                       # (6, W): one DMA
            [_row(p["b1"], Dff), _row(p["b2"], D),
             _row(p["g1"], D), _row(p["be1"], D),
             _row(p["g2"], D), _row(p["be2"], D)], axis=0)

        for a in (wqkv, wo, w1, w2, vecs):
            flat_inputs.append(a)
            in_specs.append(_full_spec(a.shape))

    # ---- outputs -------------------------------------------------------------
    out_shapes = [jax.ShapeDtypeStruct((B, total_len, D), x.dtype)]
    out_specs = [pl.BlockSpec((1, total_len, D), lambda b: (b, 0, 0))]
    if return_attention:
        for L, SP in zip(layer_lens, sp_widths):
            out_shapes.append(jax.ShapeDtypeStruct((B, L, SP), jnp.float32))
            out_specs.append(pl.BlockSpec((1, L, SP), lambda b: (b, 0, 0)))

    # ---- VMEM budget from actual resident bytes (not a hard-coded number) ---
    def _nbytes(a):
        return math.prod(a.shape) * jnp.dtype(a.dtype).itemsize

    resident = sum(_nbytes(a) for a in flat_inputs)
    resident += total_len * D * jnp.dtype(x.dtype).itemsize
    if return_attention:
        resident += sum(L * SP * 4 for L, SP in zip(layer_lens, sp_widths))
    # 2x (double-buffering) + headroom; cap at 48 MiB (safe on v7x's 64 MiB).
    vmem_limit = int(min(max(2 * resident + (4 << 20), 32 << 20), 48 << 20))

    kernel = _make_stack_kernel(tuple(layer_lens), tuple(out_offsets),
                                tuple(sp_widths), D, n_layers)

    fn = pl.pallas_call(
        kernel,
        grid=(B,),                         # batch-parallel: uses both v7x TCs
        in_specs=in_specs,
        out_specs=tuple(out_specs),
        out_shape=tuple(out_shapes),
        compiler_params=pltpu.CompilerParams(
            dimension_semantics=("parallel",),
            vmem_limit_bytes=vmem_limit),
    )
    results = fn(*flat_inputs)

    x_stack = results[0]
    attentions = []
    if return_attention:
        attentions = [results[1 + i][:, :, :L]
                      for i, L in enumerate(layer_lens)]
    return x_stack, attentions


# -----------------------------------------------------------------------------
# Deterministic parameter init.
# -----------------------------------------------------------------------------
def make_encoder_params(key, d_model, d_ff):
    keys = jax.random.split(key, 8)
    s = 0.02
    return {
        "wq": s * jax.random.normal(keys[0], (d_model, d_model), jnp.float32),
        "wk": s * jax.random.normal(keys[1], (d_model, d_model), jnp.float32),
        "wv": s * jax.random.normal(keys[2], (d_model, d_model), jnp.float32),
        "wo": s * jax.random.normal(keys[3], (d_model, d_model), jnp.float32),
        "w1": s * jax.random.normal(keys[4], (d_model, d_ff), jnp.float32),
        "b1": jnp.zeros((1, d_ff), jnp.float32),
        "w2": s * jax.random.normal(keys[5], (d_ff, d_model), jnp.float32),
        "b2": jnp.zeros((1, d_model), jnp.float32),
        "g1": jnp.ones((1, d_model), jnp.float32),
        "be1": jnp.zeros((1, d_model), jnp.float32),
        "g2": jnp.ones((1, d_model), jnp.float32),
        "be2": jnp.zeros((1, d_model), jnp.float32),
    }


# -----------------------------------------------------------------------------
# Pure-JAX reference (for a loose numerical sanity check).
# -----------------------------------------------------------------------------
def _layernorm_ref(h, g, b, eps=1e-5):
    mu = jnp.mean(h, axis=-1, keepdims=True)
    var = jnp.mean((h - mu) ** 2, axis=-1, keepdims=True)
    return (h - mu) * jax.lax.rsqrt(var + eps) * g + b


def _encoder_ref(x, p):
    D = x.shape[-1]
    hp = jax.lax.Precision.HIGHEST
    q = jnp.einsum("bsd,de->bse", x, p["wq"], precision=hp)
    k = jnp.einsum("bsd,de->bse", x, p["wk"], precision=hp)
    v = jnp.einsum("bsd,de->bse", x, p["wv"], precision=hp)
    s = jnp.einsum("bqd,bkd->bqk", q, k, precision=hp) / math.sqrt(D)
    a = jax.nn.softmax(s, axis=-1)
    ctx = jnp.einsum("bqk,bkd->bqd", a, v, precision=hp)
    proj = jnp.einsum("bsd,de->bse", ctx, p["wo"], precision=hp)
    h = _layernorm_ref(x + proj, p["g1"], p["be1"])
    ff = jnp.maximum(
        jnp.einsum("bsd,df->bsf", h, p["w1"], precision=hp) + p["b1"], 0.0)
    ff = jnp.einsum("bsf,fd->bsd", ff, p["w2"], precision=hp) + p["b2"]
    o = _layernorm_ref(h + ff, p["g2"], p["be2"])
    return o, a


def _stack_ref(x, encoders_params):
    inp_len = x.shape[1]
    outs, attns = [], []
    for p in encoders_params:
        if p is None:
            inp_len //= 2
            continue
        x, a = _encoder_ref(x[:, -inp_len:, :], p)
        outs.append(x)
        attns.append(a)
        inp_len //= 2
    return jnp.concatenate(outs, axis=-2), attns


if __name__ == "__main__":
    B, S, D, Dff = 2, 8, 32, 64

    root = jax.random.PRNGKey(0)
    k_x, k_e0, k_e1 = jax.random.split(root, 3)

    x = jax.random.normal(k_x, (B, S, D), jnp.float32)

    # Stack: [encoder, None, encoder]  ->  seq lengths processed: 8, (skip), 2
    encoders_params = [
        make_encoder_params(k_e0, D, Dff),
        None,
        make_encoder_params(k_e1, D, Dff),
    ]

    x_stack, attentions = encoder_stack_forward(x, encoders_params)
    x_stack = jax.block_until_ready(x_stack)
    attentions = [jax.block_until_ready(a) for a in attentions]

    # Shape / finiteness sanity.
    assert x_stack.shape == (B, 8 + 2, D), x_stack.shape
    assert attentions[0].shape == (B, 8, 8)
    assert attentions[1].shape == (B, 2, 2)
    assert bool(jnp.all(jnp.isfinite(x_stack)))
    assert all(bool(jnp.all(jnp.isfinite(a))) for a in attentions)

    # Loose numerical check against the pure-JAX reference.
    ref_x, ref_a = _stack_ref(x, encoders_params)
    assert bool(jnp.allclose(x_stack, ref_x, atol=2e-2, rtol=2e-2)), \
        float(jnp.max(jnp.abs(x_stack - ref_x)))
    for a, ra in zip(attentions, ref_a):
        assert bool(jnp.allclose(a, ra, atol=2e-2, rtol=2e-2))

    print("KERNEL_OK")
</pallas_src>

<mosaic_0001>
module attributes {stable_mosaic.version = 11 : i64} {
  func.func @kernel(%arg0: i32, %arg1: memref<1x8x32xf32, #tpu.memory_space<vmem>>, %arg2: memref<32x96xf32, #tpu.memory_space<vmem>>, %arg3: memref<32x32xf32, #tpu.memory_space<vmem>>, %arg4: memref<32x64xf32, #tpu.memory_space<vmem>>, %arg5: memref<64x32xf32, #tpu.memory_space<vmem>>, %arg6: memref<6x64xf32, #tpu.memory_space<vmem>>, %arg7: memref<32x96xf32, #tpu.memory_space<vmem>>, %arg8: memref<32x32xf32, #tpu.memory_space<vmem>>, %arg9: memref<32x64xf32, #tpu.memory_space<vmem>>, %arg10: memref<64x32xf32, #tpu.memory_space<vmem>>, %arg11: memref<6x64xf32, #tpu.memory_space<vmem>>, %arg12: memref<1x10x32xf32, #tpu.memory_space<vmem>>, %arg13: memref<1x8x128xf32, #tpu.memory_space<vmem>>, %arg14: memref<1x2x128xf32, #tpu.memory_space<vmem>>) attributes {dimension_semantics = [#tpu.dimension_semantics<parallel>], iteration_bounds = array<i64: 2>, scalar_prefetch = 0 : i64, scratch_operands = 0 : i64, tpu.core_type = #tpu.core_type<tc>, window_params = [{transform_indices = @transform_0, window_bounds = array<i64: 1, 8, 32>}, {pipeline_mode = #tpu.pipeline_mode<synchronous>, transform_indices = @transform_1, window_bounds = array<i64: 32, 96>}, {pipeline_mode = #tpu.pipeline_mode<synchronous>, transform_indices = @transform_2, window_bounds = array<i64: 32, 32>}, {pipeline_mode = #tpu.pipeline_mode<synchronous>, transform_indices = @transform_3, window_bounds = array<i64: 32, 64>}, {pipeline_mode = #tpu.pipeline_mode<synchronous>, transform_indices = @transform_4, window_bounds = array<i64: 64, 32>}, {pipeline_mode = #tpu.pipeline_mode<synchronous>, transform_indices = @transform_5, window_bounds = array<i64: 6, 64>}, {pipeline_mode = #tpu.pipeline_mode<synchronous>, transform_indices = @transform_6, window_bounds = array<i64: 32, 96>}, {pipeline_mode = #tpu.pipeline_mode<synchronous>, transform_indices = @transform_7, window_bounds = array<i64: 32, 32>}, {pipeline_mode = #tpu.pipeline_mode<synchronous>, transform_indices = @transform_8, window_bounds = array<i64: 32, 64>}, {pipeline_mode = #tpu.pipeline_mode<synchronous>, transform_indices = @transform_9, window_bounds = array<i64: 64, 32>}, {pipeline_mode = #tpu.pipeline_mode<synchronous>, transform_indices = @transform_10, window_bounds = array<i64: 6, 64>}, {transform_indices = @transform_11, window_bounds = array<i64: 1, 10, 32>}, {transform_indices = @transform_12, window_bounds = array<i64: 1, 8, 128>}, {transform_indices = @transform_13, window_bounds = array<i64: 1, 2, 128>}]} {
    %c0 = arith.constant 0 : index
    %c0_0 = arith.constant 0 : index
    %c0_1 = arith.constant 0 : index
    %0 = vector.load %arg1[%c0, %c0_0, %c0_1] : memref<1x8x32xf32, #tpu.memory_space<vmem>>, vector<1x8x32xf32>
    %1 = vector.shape_cast %0 : vector<1x8x32xf32> to vector<8x32xf32>
    %c0_2 = arith.constant 0 : index
    %c0_3 = arith.constant 0 : index
    %2 = vector.load %arg6[%c0_2, %c0_3] : memref<6x64xf32, #tpu.memory_space<vmem>>, vector<6x64xf32>
    %3 = vector.extract_strided_slice %2 {offsets = [0, 0], sizes = [1, 64], strides = [1, 1]} : vector<6x64xf32> to vector<1x64xf32>
    %4 = vector.extract_strided_slice %2 {offsets = [1, 0], sizes = [1, 32], strides = [1, 1]} : vector<6x64xf32> to vector<1x32xf32>
    %5 = vector.extract_strided_slice %2 {offsets = [2, 0], sizes = [1, 32], strides = [1, 1]} : vector<6x64xf32> to vector<1x32xf32>
    %6 = vector.extract_strided_slice %2 {offsets = [3, 0], sizes = [1, 32], strides = [1, 1]} : vector<6x64xf32> to vector<1x32xf32>
    %7 = vector.extract_strided_slice %2 {offsets = [4, 0], sizes = [1, 32], strides = [1, 1]} : vector<6x64xf32> to vector<1x32xf32>
    %8 = vector.extract_strided_slice %2 {offsets = [5, 0], sizes = [1, 32], strides = [1, 1]} : vector<6x64xf32> to vector<1x32xf32>
    %c0_4 = arith.constant 0 : index
    %c0_5 = arith.constant 0 : index
    %9 = vector.load %arg2[%c0_4, %c0_5] : memref<32x96xf32, #tpu.memory_space<vmem>>, vector<32x96xf32>
    %cst = arith.constant dense<0.000000e+00> : vector<8x96xf32>
    %10 = tpu.matmul %1, %9, %cst {dimension_numbers = #tpu.dot_dimension_numbers<[1], [0], [0], [1], [0, 0, 1, 1], [], []>} : vector<8x32xf32>, vector<32x96xf32>, vector<8x96xf32> -> vector<8x96xf32>
    %11 = vector.extract_strided_slice %10 {offsets = [0, 0], sizes = [8, 32], strides = [1, 1]} : vector<8x96xf32> to vector<8x32xf32>
    %12 = vector.extract_strided_slice %10 {offsets = [0, 32], sizes = [8, 32], strides = [1, 1]} : vector<8x96xf32> to vector<8x32xf32>
    %13 = vector.extract_strided_slice %10 {offsets = [0, 64], sizes = [8, 32], strides = [1, 1]} : vector<8x96xf32> to vector<8x32xf32>
    %cst_6 = arith.constant dense<0.000000e+00> : vector<8x8xf32>
    %14 = tpu.matmul %11, %12, %cst_6 {dimension_numbers = #tpu.dot_dimension_numbers<[1], [1], [0], [0], [0, 0, 1, 0], [], []>} : vector<8x32xf32>, vector<8x32xf32>, vector<8x8xf32> -> vector<8x8xf32>
    %cst_7 = arith.constant 0.176776692 : f32
    %15 = vector.broadcast %cst_7 : f32 to vector<8x8xf32>
    %16 = arith.mulf %14, %15 : vector<8x8xf32>
    %cst_8 = arith.constant dense<0xFF800000> : vector<8xf32>
    %17 = vector.multi_reduction <maximumf>, %16, %cst_8 [1] : vector<8x8xf32> to vector<8xf32>
    %18 = vector.shape_cast %17 : vector<8xf32> to vector<8x1xf32>
    %19 = vector.broadcast %18 : vector<8x1xf32> to vector<8x8xf32>
    %20 = arith.subf %16, %19 : vector<8x8xf32>
    %21 = math.exp %20 : vector<8x8xf32>
    %cst_9 = arith.constant dense<0.000000e+00> : vector<8xf32>
    %22 = vector.multi_reduction <add>, %21, %cst_9 [1] : vector<8x8xf32> to vector<8xf32>
    %23 = vector.shape_cast %22 : vector<8xf32> to vector<8x1xf32>
    %24 = vector.broadcast %23 : vector<8x1xf32> to vector<8x8xf32>
    %25 = arith.divf %21, %24 : vector<8x8xf32>
    %cst_10 = arith.constant dense<0.000000e+00> : vector<8x32xf32>
    %26 = tpu.matmul %25, %13, %cst_10 {dimension_numbers = #tpu.dot_dimension_numbers<[1], [0], [0], [1], [0, 0, 1, 1], [], []>} : vector<8x8xf32>, vector<8x32xf32>, vector<8x32xf32> -> vector<8x32xf32>
    %c0_11 = arith.constant 0 : index
    %c0_12 = arith.constant 0 : index
    %27 = vector.load %arg3[%c0_11, %c0_12] : memref<32x32xf32, #tpu.memory_space<vmem>>, vector<32x32xf32>
    %cst_13 = arith.constant dense<0.000000e+00> : vector<8x32xf32>
    %28 = tpu.matmul %26, %27, %cst_13 {dimension_numbers = #tpu.dot_dimension_numbers<[1], [0], [0], [1], [0, 0, 1, 1], [], []>} : vector<8x32xf32>, vector<32x32xf32>, vector<8x32xf32> -> vector<8x32xf32>
    %29 = arith.addf %1, %28 : vector<8x32xf32>
    %cst_14 = arith.constant dense<0.000000e+00> : vector<8xf32>
    %30 = vector.multi_reduction <add>, %29, %cst_14 [1] : vector<8x32xf32> to vector<8xf32>
    %31 = vector.shape_cast %30 : vector<8xf32> to vector<8x1xf32>
    %cst_15 = arith.constant 3.200000e+01 : f32
    %32 = vector.broadcast %cst_15 : f32 to vector<8x1xf32>
    %33 = arith.divf %31, %32 : vector<8x1xf32>
    %34 = vector.broadcast %33 : vector<8x1xf32> to vector<8x32xf32>
    %35 = arith.subf %29, %34 : vector<8x32xf32>
    %36 = arith.mulf %35, %35 : vector<8x32xf32>
    %cst_16 = arith.constant dense<0.000000e+00> : vector<8xf32>
    %37 = vector.multi_reduction <add>, %36, %cst_16 [1] : vector<8x32xf32> to vector<8xf32>
    %38 = vector.shape_cast %37 : vector<8xf32> to vector<8x1xf32>
    %cst_17 = arith.constant 3.200000e+01 : f32
    %39 = vector.broadcast %cst_17 : f32 to vector<8x1xf32>
    %40 = arith.divf %38, %39 : vector<8x1xf32>
    %41 = vector.broadcast %33 : vector<8x1xf32> to vector<8x32xf32>
    %42 = arith.subf %29, %41 : vector<8x32xf32>
    %cst_18 = arith.constant 9.99999974E-6 : f32
    %43 = vector.broadcast %cst_18 : f32 to vector<8x1xf32>
    %44 = arith.addf %40, %43 : vector<8x1xf32>
    %45 = math.rsqrt %44 : vector<8x1xf32>
    %46 = vector.broadcast %45 : vector<8x1xf32> to vector<8x32xf32>
    %47 = arith.mulf %42, %46 : vector<8x32xf32>
    %48 = vector.broadcast %5 : vector<1x32xf32> to vector<8x32xf32>
    %49 = arith.mulf %47, %48 : vector<8x32xf32>
    %50 = vector.broadcast %6 : vector<1x32xf32> to vector<8x32xf32>
    %51 = arith.addf %49, %50 : vector<8x32xf32>
    %c0_19 = arith.constant 0 : index
    %c0_20 = arith.constant 0 : index
    %52 = vector.load %arg4[%c0_19, %c0_20] : memref<32x64xf32, #tpu.memory_space<vmem>>, vector<32x64xf32>
    %cst_21 = arith.constant dense<0.000000e+00> : vector<8x64xf32>
    %53 = tpu.matmul %51, %52, %cst_21 {dimension_numbers = #tpu.dot_dimension_numbers<[1], [0], [0], [1], [0, 0, 1, 1], [], []>} : vector<8x32xf32>, vector<32x64xf32>, vector<8x64xf32> -> vector<8x64xf32>
    %54 = vector.broadcast %3 : vector<1x64xf32> to vector<8x64xf32>
    %55 = arith.addf %53, %54 : vector<8x64xf32>
    %cst_22 = arith.constant 0.000000e+00 : f32
    %56 = vector.broadcast %cst_22 : f32 to vector<8x64xf32>
    %57 = arith.maximumf %55, %56 : vector<8x64xf32>
    %c0_23 = arith.constant 0 : index
    %c0_24 = arith.constant 0 : index
    %58 = vector.load %arg5[%c0_23, %c0_24] : memref<64x32xf32, #tpu.memory_space<vmem>>, vector<64x32xf32>
    %cst_25 = arith.constant dense<0.000000e+00> : vector<8x32xf32>
    %59 = tpu.matmul %57, %58, %cst_25 {dimension_numbers = #tpu.dot_dimension_numbers<[1], [0], [0], [1], [0, 0, 1, 1], [], []>} : vector<8x64xf32>, vector<64x32xf32>, vector<8x32xf32> -> vector<8x32xf32>
    %60 = vector.broadcast %4 : vector<1x32xf32> to vector<8x32xf32>
    %61 = arith.addf %59, %60 : vector<8x32xf32>
    %62 = arith.addf %51, %61 : vector<8x32xf32>
    %cst_26 = arith.constant dense<0.000000e+00> : vector<8xf32>
    %63 = vector.multi_reduction <add>, %62, %cst_26 [1] : vector<8x32xf32> to vector<8xf32>
    %64 = vector.shape_cast %63 : vector<8xf32> to vector<8x1xf32>
    %cst_27 = arith.constant 3.200000e+01 : f32
    %65 = vector.broadcast %cst_27 : f32 to vector<8x1xf32>
    %66 = arith.divf %64, %65 : vector<8x1xf32>
    %67 = vector.broadcast %66 : vector<8x1xf32> to vector<8x32xf32>
    %68 = arith.subf %62, %67 : vector<8x32xf32>
    %69 = arith.mulf %68, %68 : vector<8x32xf32>
    %cst_28 = arith.constant dense<0.000000e+00> : vector<8xf32>
    %70 = vector.multi_reduction <add>, %69, %cst_28 [1] : vector<8x32xf32> to vector<8xf32>
    %71 = vector.shape_cast %70 : vector<8xf32> to vector<8x1xf32>
    %cst_29 = arith.constant 3.200000e+01 : f32
    %72 = vector.broadcast %cst_29 : f32 to vector<8x1xf32>
    %73 = arith.divf %71, %72 : vector<8x1xf32>
    %74 = vector.broadcast %66 : vector<8x1xf32> to vector<8x32xf32>
    %75 = arith.subf %62, %74 : vector<8x32xf32>
    %cst_30 = arith.constant 9.99999974E-6 : f32
    %76 = vector.broadcast %cst_30 : f32 to vector<8x1xf32>
    %77 = arith.addf %73, %76 : vector<8x1xf32>
    %78 = math.rsqrt %77 : vector<8x1xf32>
    %79 = vector.broadcast %78 : vector<8x1xf32> to vector<8x32xf32>
    %80 = arith.mulf %75, %79 : vector<8x32xf32>
    %81 = vector.broadcast %7 : vector<1x32xf32> to vector<8x32xf32>
    %82 = arith.mulf %80, %81 : vector<8x32xf32>
    %83 = vector.broadcast %8 : vector<1x32xf32> to vector<8x32xf32>
    %84 = arith.addf %82, %83 : vector<8x32xf32>
    %c0_31 = arith.constant 0 : index
    %c0_32 = arith.constant 0 : index
    %c0_33 = arith.constant 0 : index
    %85 = vector.load %arg12[%c0_31, %c0_32, %c0_33] : memref<1x10x32xf32, #tpu.memory_space<vmem>>, vector<1x8x32xf32>
    %86 = vector.shape_cast %85 : vector<1x8x32xf32> to vector<8x32xf32>
    %87 = vector.shape_cast %84 : vector<8x32xf32> to vector<1x8x32xf32>
    tpu.vector_store %arg12[%c0_31, %c0_32, %c0_33], %87 {strides = array<i32>} : memref<1x10x32xf32, #tpu.memory_space<vmem>>, vector<1x8x32xf32>,
    %cst_34 = arith.constant 0.000000e+00 : f32
    %88 = vector.broadcast %cst_34 : f32 to vector<8x120xf32>
    %89 = tpu.concatenate %25, %88 in 1 : vector<8x8xf32>, vector<8x120xf32> -> vector<8x128xf32>
    %c0_35 = arith.constant 0 : index
    %c0_36 = arith.constant 0 : index
    %c0_37 = arith.constant 0 : index
    %90 = vector.load %arg13[%c0_35, %c0_36, %c0_37] : memref<1x8x128xf32, #tpu.memory_space<vmem>>, vector<1x8x128xf32>
    %91 = vector.shape_cast %90 : vector<1x8x128xf32> to vector<8x128xf32>
    %92 = vector.shape_cast %89 : vector<8x128xf32> to vector<1x8x128xf32>
    tpu.vector_store %arg13[%c0_35, %c0_36, %c0_37], %92 {strides = array<i32>} : memref<1x8x128xf32, #tpu.memory_space<vmem>>, vector<1x8x128xf32>,
    %c0_38 = arith.constant 0 : index
    %c0_39 = arith.constant 0 : index
    %93 = vector.load %arg11[%c0_38, %c0_39] : memref<6x64xf32, #tpu.memory_space<vmem>>, vector<6x64xf32>
    %94 = vector.extract_strided_slice %93 {offsets = [0, 0], sizes = [1, 64], strides = [1, 1]} : vector<6x64xf32> to vector<1x64xf32>
    %95 = vector.extract_strided_slice %93 {offsets = [1, 0], sizes = [1, 32], strides = [1, 1]} : vector<6x64xf32> to vector<1x32xf32>
    %96 = vector.extract_strided_slice %93 {offsets = [2, 0], sizes = [1, 32], strides = [1, 1]} : vector<6x64xf32> to vector<1x32xf32>
    %97 = vector.extract_strided_slice %93 {offsets = [3, 0], sizes = [1, 32], strides = [1, 1]} : vector<6x64xf32> to vector<1x32xf32>
    %98 = vector.extract_strided_slice %93 {offsets = [4, 0], sizes = [1, 32], strides = [1, 1]} : vector<6x64xf32> to vector<1x32xf32>
    %99 = vector.extract_strided_slice %93 {offsets = [5, 0], sizes = [1, 32], strides = [1, 1]} : vector<6x64xf32> to vector<1x32xf32>
    %100 = vector.extract_strided_slice %84 {offsets = [6, 0], sizes = [2, 32], strides = [1, 1]} : vector<8x32xf32> to vector<2x32xf32>
    %c0_40 = arith.constant 0 : index
    %c0_41 = arith.constant 0 : index
    %101 = vector.load %arg7[%c0_40, %c0_41] : memref<32x96xf32, #tpu.memory_space<vmem>>, vector<32x96xf32>
    %cst_42 = arith.constant dense<0.000000e+00> : vector<2x96xf32>
    %102 = tpu.matmul %100, %101, %cst_42 {dimension_numbers = #tpu.dot_dimension_numbers<[1], [0], [0], [1], [0, 0, 1, 1], [], []>} : vector<2x32xf32>, vector<32x96xf32>, vector<2x96xf32> -> vector<2x96xf32>
    %103 = vector.extract_strided_slice %102 {offsets = [0, 0], sizes = [2, 32], strides = [1, 1]} : vector<2x96xf32> to vector<2x32xf32>
    %104 = vector.extract_strided_slice %102 {offsets = [0, 32], sizes = [2, 32], strides = [1, 1]} : vector<2x96xf32> to vector<2x32xf32>
    %105 = vector.extract_strided_slice %102 {offsets = [0, 64], sizes = [2, 32], strides = [1, 1]} : vector<2x96xf32> to vector<2x32xf32>
    %cst_43 = arith.constant dense<0.000000e+00> : vector<2x2xf32>
    %106 = tpu.matmul %103, %104, %cst_43 {dimension_numbers = #tpu.dot_dimension_numbers<[1], [1], [0], [0], [0, 0, 1, 0], [], []>} : vector<2x32xf32>, vector<2x32xf32>, vector<2x2xf32> -> vector<2x2xf32>
    %cst_44 = arith.constant 0.176776692 : f32
    %107 = vector.broadcast %cst_44 : f32 to vector<2x2xf32>
    %108 = arith.mulf %106, %107 : vector<2x2xf32>
    %cst_45 = arith.constant dense<0xFF800000> : vector<2xf32>
    %109 = vector.multi_reduction <maximumf>, %108, %cst_45 [1] : vector<2x2xf32> to vector<2xf32>
    %110 = vector.shape_cast %109 : vector<2xf32> to vector<2x1xf32>
    %111 = vector.broadcast %110 : vector<2x1xf32> to vector<2x2xf32>
    %112 = arith.subf %108, %111 : vector<2x2xf32>
    %113 = math.exp %112 : vector<2x2xf32>
    %cst_46 = arith.constant dense<0.000000e+00> : vector<2xf32>
    %114 = vector.multi_reduction <add>, %113, %cst_46 [1] : vector<2x2xf32> to vector<2xf32>
    %115 = vector.shape_cast %114 : vector<2xf32> to vector<2x1xf32>
    %116 = vector.broadcast %115 : vector<2x1xf32> to vector<2x2xf32>
    %117 = arith.divf %113, %116 : vector<2x2xf32>
    %cst_47 = arith.constant dense<0.000000e+00> : vector<2x32xf32>
    %118 = tpu.matmul %117, %105, %cst_47 {dimension_numbers = #tpu.dot_dimension_numbers<[1], [0], [0], [1], [0, 0, 1, 1], [], []>} : vector<2x2xf32>, vector<2x32xf32>, vector<2x32xf32> -> vector<2x32xf32>
    %c0_48 = arith.constant 0 : index
    %c0_49 = arith.constant 0 : index
    %119 = vector.load %arg8[%c0_48, %c0_49] : memref<32x32xf32, #tpu.memory_space<vmem>>, vector<32x32xf32>
    %cst_50 = arith.constant dense<0.000000e+00> : vector<2x32xf32>
    %120 = tpu.matmul %118, %119, %cst_50 {dimension_numbers = #tpu.dot_dimension_numbers<[1], [0], [0], [1], [0, 0, 1, 1], [], []>} : vector<2x32xf32>, vector<32x32xf32>, vector<2x32xf32> -> vector<2x32xf32>
    %121 = arith.addf %100, %120 : vector<2x32xf32>
    %cst_51 = arith.constant dense<0.000000e+00> : vector<2xf32>
    %122 = vector.multi_reduction <add>, %121, %cst_51 [1] : vector<2x32xf32> to vector<2xf32>
    %123 = vector.shape_cast %122 : vector<2xf32> to vector<2x1xf32>
    %cst_52 = arith.constant 3.200000e+01 : f32
    %124 = vector.broadcast %cst_52 : f32 to vector<2x1xf32>
    %125 = arith.divf %123, %124 : vector<2x1xf32>
    %126 = vector.broadcast %125 : vector<2x1xf32> to vector<2x32xf32>
    %127 = arith.subf %121, %126 : vector<2x32xf32>
    %128 = arith.mulf %127, %127 : vector<2x32xf32>
    %cst_53 = arith.constant dense<0.000000e+00> : vector<2xf32>
    %129 = vector.multi_reduction <add>, %128, %cst_53 [1] : vector<2x32xf32> to vector<2xf32>
    %130 = vector.shape_cast %129 : vector<2xf32> to vector<2x1xf32>
    %cst_54 = arith.constant 3.200000e+01 : f32
    %131 = vector.broadcast %cst_54 : f32 to vector<2x1xf32>
    %132 = arith.divf %130, %131 : vector<2x1xf32>
    %133 = vector.broadcast %125 : vector<2x1xf32> to vector<2x32xf32>
    %134 = arith.subf %121, %133 : vector<2x32xf32>
    %cst_55 = arith.constant 9.99999974E-6 : f32
    %135 = vector.broadcast %cst_55 : f32 to vector<2x1xf32>
    %136 = arith.addf %132, %135 : vector<2x1xf32>
    %137 = math.rsqrt %136 : vector<2x1xf32>
    %138 = vector.broadcast %137 : vector<2x1xf32> to vector<2x32xf32>
    %139 = arith.mulf %134, %138 : vector<2x32xf32>
    %140 = vector.broadcast %96 : vector<1x32xf32> to vector<2x32xf32>
    %141 = arith.mulf %139, %140 : vector<2x32xf32>
    %142 = vector.broadcast %97 : vector<1x32xf32> to vector<2x32xf32>
    %143 = arith.addf %141, %142 : vector<2x32xf32>
    %c0_56 = arith.constant 0 : index
    %c0_57 = arith.constant 0 : index
    %144 = vector.load %arg9[%c0_56, %c0_57] : memref<32x64xf32, #tpu.memory_space<vmem>>, vector<32x64xf32>
    %cst_58 = arith.constant dense<0.000000e+00> : vector<2x64xf32>
    %145 = tpu.matmul %143, %144, %cst_58 {dimension_numbers = #tpu.dot_dimension_numbers<[1], [0], [0], [1], [0, 0, 1, 1], [], []>} : vector<2x32xf32>, vector<32x64xf32>, vector<2x64xf32> -> vector<2x64xf32>
    %146 = vector.broadcast %94 : vector<1x64xf32> to vector<2x64xf32>
    %147 = arith.addf %145, %146 : vector<2x64xf32>
    %cst_59 = arith.constant 0.000000e+00 : f32
    %148 = vector.broadcast %cst_59 : f32 to vector<2x64xf32>
    %149 = arith.maximumf %147, %148 : vector<2x64xf32>
    %c0_60 = arith.constant 0 : index
    %c0_61 = arith.constant 0 : index
    %150 = vector.load %arg10[%c0_60, %c0_61] : memref<64x32xf32, #tpu.memory_space<vmem>>, vector<64x32xf32>
    %cst_62 = arith.constant dense<0.000000e+00> : vector<2x32xf32>
    %151 = tpu.matmul %149, %150, %cst_62 {dimension_numbers = #tpu.dot_dimension_numbers<[1], [0], [0], [1], [0, 0, 1, 1], [], []>} : vector<2x64xf32>, vector<64x32xf32>, vector<2x32xf32> -> vector<2x32xf32>
    %152 = vector.broadcast %95 : vector<1x32xf32> to vector<2x32xf32>
    %153 = arith.addf %151, %152 : vector<2x32xf32>
    %154 = arith.addf %143, %153 : vector<2x32xf32>
    %cst_63 = arith.constant dense<0.000000e+00> : vector<2xf32>
    %155 = vector.multi_reduction <add>, %154, %cst_63 [1] : vector<2x32xf32> to vector<2xf32>
    %156 = vector.shape_cast %155 : vector<2xf32> to vector<2x1xf32>
    %cst_64 = arith.constant 3.200000e+01 : f32
    %157 = vector.broadcast %cst_64 : f32 to vector<2x1xf32>
    %158 = arith.divf %156, %157 : vector<2x1xf32>
    %159 = vector.broadcast %158 : vector<2x1xf32> to vector<2x32xf32>
    %160 = arith.subf %154, %159 : vector<2x32xf32>
    %161 = arith.mulf %160, %160 : vector<2x32xf32>
    %cst_65 = arith.constant dense<0.000000e+00> : vector<2xf32>
    %162 = vector.multi_reduction <add>, %161, %cst_65 [1] : vector<2x32xf32> to vector<2xf32>
    %163 = vector.shape_cast %162 : vector<2xf32> to vector<2x1xf32>
    %cst_66 = arith.constant 3.200000e+01 : f32
    %164 = vector.broadcast %cst_66 : f32 to vector<2x1xf32>
    %165 = arith.divf %163, %164 : vector<2x1xf32>
    %166 = vector.broadcast %158 : vector<2x1xf32> to vector<2x32xf32>
    %167 = arith.subf %154, %166 : vector<2x32xf32>
    %cst_67 = arith.constant 9.99999974E-6 : f32
    %168 = vector.broadcast %cst_67 : f32 to vector<2x1xf32>
    %169 = arith.addf %165, %168 : vector<2x1xf32>
    %170 = math.rsqrt %169 : vector<2x1xf32>
    %171 = vector.broadcast %170 : vector<2x1xf32> to vector<2x32xf32>
    %172 = arith.mulf %167, %171 : vector<2x32xf32>
    %173 = vector.broadcast %98 : vector<1x32xf32> to vector<2x32xf32>
    %174 = arith.mulf %172, %173 : vector<2x32xf32>
    %175 = vector.broadcast %99 : vector<1x32xf32> to vector<2x32xf32>
    %176 = arith.addf %174, %175 : vector<2x32xf32>
    %c0_68 = arith.constant 0 : index
    %c8 = arith.constant 8 : index
    %c0_69 = arith.constant 0 : index
    %177 = vector.load %arg12[%c0_68, %c8, %c0_69] : memref<1x10x32xf32, #tpu.memory_space<vmem>>, vector<1x2x32xf32>
    %178 = vector.shape_cast %177 : vector<1x2x32xf32> to vector<2x32xf32>
    %179 = vector.shape_cast %176 : vector<2x32xf32> to vector<1x2x32xf32>
    tpu.vector_store %arg12[%c0_68, %c8, %c0_69], %179 {strides = array<i32>} : memref<1x10x32xf32, #tpu.memory_space<vmem>>, vector<1x2x32xf32>,
    %cst_70 = arith.constant 0.000000e+00 : f32
    %180 = vector.broadcast %cst_70 : f32 to vector<2x126xf32>
    %181 = tpu.concatenate %117, %180 in 1 : vector<2x2xf32>, vector<2x126xf32> -> vector<2x128xf32>
    %c0_71 = arith.constant 0 : index
    %c0_72 = arith.constant 0 : index
    %c0_73 = arith.constant 0 : index
    %182 = vector.load %arg14[%c0_71, %c0_72, %c0_73] : memref<1x2x128xf32, #tpu.memory_space<vmem>>, vector<1x2x128xf32>
    %183 = vector.shape_cast %182 : vector<1x2x128xf32> to vector<2x128xf32>
    %184 = vector.shape_cast %181 : vector<2x128xf32> to vector<1x2x128xf32>
    tpu.vector_store %arg14[%c0_71, %c0_72, %c0_73], %184 {strides = array<i32>} : memref<1x2x128xf32, #tpu.memory_space<vmem>>, vector<1x2x128xf32>,
    return
  }
  func.func @transform_0(%arg0: i32) -> (i32, i32, i32) {
    %c0_i32 = arith.constant 0 : i32
    %c0_i32_0 = arith.constant 0 : i32
    %c0_i32_1 = arith.constant 0 : i32
    return %arg0, %c0_i32, %c0_i32_0 : i32, i32, i32
  }
  func.func @transform_1(%arg0: i32) -> (i32, i32) {
    %c0_i32 = arith.constant 0 : i32
    %c0_i32_0 = arith.constant 0 : i32
    %c0_i32_1 = arith.constant 0 : i32
    return %c0_i32, %c0_i32_0 : i32, i32
  }
  func.func @transform_2(%arg0: i32) -> (i32, i32) {
    %c0_i32 = arith.constant 0 : i32
    %c0_i32_0 = arith.constant 0 : i32
    %c0_i32_1 = arith.constant 0 : i32
    return %c0_i32, %c0_i32_0 : i32, i32
  }
  func.func @transform_3(%arg0: i32) -> (i32, i32) {
    %c0_i32 = arith.constant 0 : i32
    %c0_i32_0 = arith.constant 0 : i32
    %c0_i32_1 = arith.constant 0 : i32
    return %c0_i32, %c0_i32_0 : i32, i32
  }
  func.func @transform_4(%arg0: i32) -> (i32, i32) {
    %c0_i32 = arith.constant 0 : i32
    %c0_i32_0 = arith.constant 0 : i32
    %c0_i32_1 = arith.constant 0 : i32
    return %c0_i32, %c0_i32_0 : i32, i32
  }
  func.func @transform_5(%arg0: i32) -> (i32, i32) {
    %c0_i32 = arith.constant 0 : i32
    %c0_i32_0 = arith.constant 0 : i32
    %c0_i32_1 = arith.constant 0 : i32
    return %c0_i32, %c0_i32_0 : i32, i32
  }
  func.func @transform_6(%arg0: i32) -> (i32, i32) {
    %c0_i32 = arith.constant 0 : i32
    %c0_i32_0 = arith.constant 0 : i32
    %c0_i32_1 = arith.constant 0 : i32
    return %c0_i32, %c0_i32_0 : i32, i32
  }
  func.func @transform_7(%arg0: i32) -> (i32, i32) {
    %c0_i32 = arith.constant 0 : i32
    %c0_i32_0 = arith.constant 0 : i32
    %c0_i32_1 = arith.constant 0 : i32
    return %c0_i32, %c0_i32_0 : i32, i32
  }
  func.func @transform_8(%arg0: i32) -> (i32, i32) {
    %c0_i32 = arith.constant 0 : i32
    %c0_i32_0 = arith.constant 0 : i32
    %c0_i32_1 = arith.constant 0 : i32
    return %c0_i32, %c0_i32_0 : i32, i32
  }
  func.func @transform_9(%arg0: i32) -> (i32, i32) {
    %c0_i32 = arith.constant 0 : i32
    %c0_i32_0 = arith.constant 0 : i32
    %c0_i32_1 = arith.constant 0 : i32
    return %c0_i32, %c0_i32_0 : i32, i32
  }
  func.func @transform_10(%arg0: i32) -> (i32, i32) {
    %c0_i32 = arith.constant 0 : i32
    %c0_i32_0 = arith.constant 0 : i32
    %c0_i32_1 = arith.constant 0 : i32
    return %c0_i32, %c0_i32_0 : i32, i32
  }
  func.func @transform_11(%arg0: i32) -> (i32, i32, i32) {
    %c0_i32 = arith.constant 0 : i32
    %c0_i32_0 = arith.constant 0 : i32
    %c0_i32_1 = arith.constant 0 : i32
    return %arg0, %c0_i32, %c0_i32_0 : i32, i32, i32
  }
  func.func @transform_12(%arg0: i32) -> (i32, i32, i32) {
    %c0_i32 = arith.constant 0 : i32
    %c0_i32_0 = arith.constant 0 : i32
    %c0_i32_1 = arith.constant 0 : i32
    return %arg0, %c0_i32, %c0_i32_0 : i32, i32, i32
  }
  func.func @transform_13(%arg0: i32) -> (i32, i32, i32) {
    %c0_i32 = arith.constant 0 : i32
    %c0_i32_0 = arith.constant 0 : i32
    %c0_i32_1 = arith.constant 0 : i32
    return %arg0, %c0_i32, %c0_i32_0 : i32, i32, i32
  }
}

</mosaic_0001>

<bundles_post_ra>
// kernel: tpu_custom_call.1
= control target key start
LH: loop header
LB: loop body
LE: loop exit
PB: predicated region body
PF: predicated region fallthrough
CT: control target
= control target key end

     0   :  { %s2841_s0 = inlined_call_operand.hbm [shape: f32[2,8,32], index: 0, kind: input, shape index: {}]   ;;  %s2842_s1 = inlined_call_operand.vmem [shape: f32[32,96], index: 1, kind: input, shape index: {}]   ;;  %s2843_s2 = inlined_call_operand.vmem [shape: f32[32,32], index: 2, kind: input, shape index: {}]   ;;  %s2844_s3 = inlined_call_operand.vmem [shape: f32[32,64], index: 3, kind: input, shape index: {}]   ;;  %s2845_s4 = inlined_call_operand.vmem [shape: f32[64,32], index: 4, kind: input, shape index: {}]   ;;  %s2846_s5 = inlined_call_operand.vmem [shape: f32[6,64], index: 5, kind: input, shape index: {}]   ;;  %s2847_s6 = inlined_call_operand.vmem [shape: f32[32,96], index: 6, kind: input, shape index: {}]   ;;  %s2848_s7 = inlined_call_operand.vmem [shape: f32[32,32], index: 7, kind: input, shape index: {}]   ;;  %s2849_s8 = inlined_call_operand.hbm [shape: f32[32,64], index: 8, kind: input, shape index: {}]   ;;  %s2850_s9 = inlined_call_operand.vmem [shape: f32[64,32], index: 9, kind: input, shape index: {}]   ;;  %s2851_s10 = inlined_call_operand.vmem [shape: f32[6,64], index: 10, kind: input, shape index: {}]   ;;  %s2852_s11 = inlined_call_operand.vmem [shape: f32[2,10,32], index: 11, kind: output, shape index: {0}]   ;;  %s2853_s12 = inlined_call_operand.hbm [shape: f32[2,8,128], index: 12, kind: output, shape index: {1}]   ;;  %s2854_s13 = inlined_call_operand.hbm [shape: f32[2,2,128], index: 13, kind: output, shape index: {2}]  }
   0x1   :  { %2864 = sst [smem:[#allocation17_spill]] %s2841_s0 }
   0x2   :  { %2865 = sst [smem:[#allocation18_spill]] %s2842_s1 }
   0x3   :  { %2866 = sst [smem:[#allocation19_spill]] %s2843_s2 }
   0x4   :  { %2867 = sst [smem:[#allocation20_spill]] %s2844_s3 }
   0x5   :  { %2868 = sst [smem:[#allocation21_spill]] %s2851_s10 }
   0x6   :  { %2869 = sst [smem:[#allocation22_spill]] %s2853_s12 }
   0x7   :  { %2870 = sst [smem:[#allocation23_spill]] %s2854_s13 }
   0x8   :  { %19 = vsyncpa [#allocation3], 0 }
   0x9   :  { %21 = vsyncpa [#allocation3 + $0x1], 0 }
   0xa   :  { %22 = vsyncpa [#allocation6], 0 }
   0xb   :  { %23 = vsyncpa [#allocation4], 0 }
   0xc   :  { %25 = vsyncpa [#allocation4 + $0x1], 0 }
   0xd   :  { %26 = vsyncpa [#allocation9], 0 }
   0xe   :  { %28 = vsyncpa [#allocation9 + $0x1], 0  ;;  %s2368_s25 = smov 0   ;;  %s2370_s26 = smov 0  }
   0xf   :  { %s2372_s27 = smov 0   ;;  %s2374_s28 = smov 0  }
  0x10 LB: > { %2871 = sst [smem:[#allocation14_spill]] %s2273_s25  ;;  %s2389_s29 = sadd.s32 4294967295, %s2285_s28   ;;  %s2285_s28 = sphi %s2374_s28, %s2896_s28   ;;  %s2281_s27 = sphi %s2372_s27, %s2899_s27   ;;  %s2277_s26 = sphi %s2370_s26, %s2898_s26   ;;  %s2273_s25 = sphi %s2368_s25, %s2897_s25  }
  0x11   : > { %s1765_s30 = sadd.s32 4294967294, %s2285_s28   ;;  %p54_p0 = scmp.ne.s32.totalorder %s2277_s26, %s2273_s25 }
  0x12   : > { %p2860_p1 = scmp.eq.s32.totalorder %s2389_s29, 0  ;;  %p320_p3 = scmp.eq.s32.totalorder %s1765_s30, 1 }
  0x13   : > { %p1766_p5 = scmp.ge.s32.totalorder %s2285_s28, 1  ;;  %p353_p7 = scmp.lt.s32.totalorder %s2285_s28, 3 }
  0x14   : > { %p2398_p4 = por %p2860_p1, %p54_p0  ;;  %p2403_p6 = por %p320_p3, %p54_p0 }
  0x15   : > { %p2408_p8 = pnand %p1766_p5, %p353_p7  ;;  %s2287_s17 = smov [#allocation5]  }
  0x16   : > { %s2872_s14 = scalar_select %p2398_p4, 1, 0 }
  0x17   : > { %s2873_s15 = scalar_select %p2403_p6, 1, 0 }
  0x18   : > { %s2875_s16 = scalar_select %p2408_p8, 1, 0 }
  0x19   : > { %2874 = sst [smem:[#allocation15_spill]] %s2873_s15  ;;  %s386_s18 = sshll.u32 %s2287_s17, 4  ;;  %s2412_s18 = int_to_ptr.vmem [resolvable:$true] %s386_s18 }
  0x1a   : > { %p2050_p9 = pneg %p2408_p8  ;;  %s2424_s20 = sadd.s32 1, %s2285_s28  }
  0x1b   : > { %2877 = sst [smem:[#allocation16_spill]] %s2424_s20  ;;  %s41_s21 = sadd.s32 1, %s2281_s27 }
  0x1c   : > { %p2419_p11 = pnand %p2050_p9, %p2860_p1  ;;  %s38_s22 = ssub.s32 %s2285_s28, %s2424_s20 }
  0x1d   : > { %s2125_s30 = scalar_lea.hbm %s2849_s8, 512 }
  0x1e   : > { %p2126_p12 = scmp.ne.s32.totalorder %s2849_s8, %s2125_s30  ;;  %p2127_p13 = pneg %p2419_p11 }
  0x1f   : > { %p2132_p5 = scmp.lt.u32.totalorder %s2125_s30, %s2849_s8 }
  0x20   : > { %p2128_p0 = pnand %p2127_p13, %p2126_p12 }
  0x22   : > { %p2129_p3 = pneg %p2128_p0 }
  0x24   : > { %p2134_p7 = pnand %p2132_p5, %p2129_p3 }
  0x26   : > { %2137 = shalt.err (!%p2134_p7)
}
  0x27   : > { %s2138_s20 = scalar_lea.vmem %s2412_s18, 512  ;;  %p2146_p2 = scmp.lt.s32.totalorder %s2412_s18, %s2412_s18 }
  0x28   : > { %p2139_p9 = scmp.ne.s32.totalorder %s2412_s18, %s2138_s20  ;;  %p2147_p6 = scmp.lt.s32.totalorder %s2138_s20, %s2138_s20 }
  0x2a   : > { %p2141_p10 = pnand %p2139_p9, %p2127_p13  ;;  %p2148_p4 = por %p2147_p6, %p2146_p2 }
  0x2c   : > { %p2142_p1 = pneg %p2141_p10 }
  0x2e   : > { %p2149_p8 = pnand %p2148_p4, %p2142_p1 }
  0x30   : > { %2152 = shalt.err (!%p2149_p8)
}
  0x31   : > { %s2288_s15 = smov 128   ;;  %s2289_s13 = smov 8  }
  0x32   : > { %2053 = dma.hbm_to_vmem [thread:$0]  (!%p2419_p11), %s2849_s8, 512, %s2412_s18, [#allocation6], %s2288_s15, %s2288_s15, %s2289_s13  }
  0x33   : > { %p39_p2 = scmp.eq.s32.totalorder %s38_s22, 0  ;;  %p48_p1 = scmp.ne.s32.totalorder %s2281_s27, %s2277_s26 }
  0x34   : > { %p49_p4 = scmp.eq.s32.totalorder %s2285_s28, 0  ;;  %p2066_p6 = scmp.lt.s32.totalorder %s2285_s28, 2 }
  0x35   : > { %s2455_s20 = scalar_select %p39_p2, %s2281_s27, %s41_s21  }
  0x36   : > { %p50_p8 = por %p49_p4, %p48_p1  ;;  %p2878_p10 = scmp.eq.s32.totalorder %s2389_s29, 1 }
  0x37   : > { %s406_s30 = sand.u32 1, %s2281_s27   ;;  %s1770_s17 = sshll.u32 %s2285_s28, 7 }
  0x38   : > { %p2459_p12 = por %p2878_p10, %p48_p1  ;;  %s1769_s12 = sshll.u32 %s406_s30, 3 }
  0x39   : > { %s2880_s0 = sld [smem:[#allocation17_spill]]  ;;  %s410_s18 = scalar_lea.vmem [#allocation2], %s1769_s12 }
  0x3a   : > { %s417_s21 = sshll.u32 %s410_s18, 4  ;;  %p2470_p11 = pnand %p2066_p6, %p50_p8  ;;  %s2474_s21 = int_to_ptr.vmem [resolvable:$true] %s417_s21 }
  0x3b   : > { %s407_s15 = scalar_lea.sflag [#allocation3], %s406_s30 }
  0x3c   : > { %p2155_p0 = pneg %p2470_p11 }
  0x3f   : > { %s2468_s25 = scalar_lea.hbm %s2880_s0, %s1770_s17  ;;  %s2158_s23 = scalar_lea.hbm %s2880_s0, 256 }
  0x40   : > { %s2153_s13 = scalar_lea.hbm %s2468_s25, 128  ;;  %p2159_p7 = scmp.lt.u32.totalorder %s2468_s25, %s2880_s0 }
  0x41   : > { %p2154_p13 = scmp.ne.s32.totalorder %s2468_s25, %s2153_s13  ;;  %p2160_p9 = scmp.lt.u32.totalorder %s2158_s23, %s2153_s13 }
  0x42   : > { %p2162_p1 = scmp.lt.u32.totalorder %s2153_s13, %s2468_s25 }
  0x43   : > { %p2156_p3 = pnand %p2155_p0, %p2154_p13  ;;  %p2161_p2 = por %p2160_p9, %p2159_p7 }
  0x45   : > { %p2157_p5 = pneg %p2156_p3  ;;  %p2163_p4 = por %p2162_p1, %p2161_p2 }
  0x47   : > { %p2164_p6 = pnand %p2163_p4, %p2157_p5 }
  0x49   : > { %2167 = shalt.err (!%p2164_p6)
}
  0x4a   : > { %s2168_s30 = scalar_lea.vmem %s2474_s21, 128  ;;  %s2290_s18 = smov [#allocation2]  }
  0x4b   : > { %p2169_p8 = scmp.ne.s32.totalorder %s2474_s21, %s2168_s30  ;;  %s2173_s10 = sshll.u32 %s2290_s18, 4  ;;  %s2174_s10 = int_to_ptr.vmem [resolvable:$false] %s2173_s10 }
  0x4c   : > { %s2175_s12 = scalar_lea.vmem %s2174_s10, 256  ;;  %p2176_p3 = scmp.lt.s32.totalorder %s2474_s21, %s2174_s10 }
  0x4d   : > { %p2171_p10 = pnand %p2169_p8, %p2155_p0  ;;  %p2177_p7 = scmp.lt.s32.totalorder %s2175_s12, %s2168_s30 }
  0x4f   : > { %p2172_p13 = pneg %p2171_p10  ;;  %p2178_p9 = por %p2177_p7, %p2176_p3 }
  0x51   : > { %p2179_p2 = pnand %p2178_p9, %p2172_p13 }
  0x53   : > { %2182 = shalt.err (!%p2179_p2)
}
  0x54   : > { %2057 = dma.hbm_to_vmem [thread:$0]  (!%p2470_p11), %s2468_s25, 128, %s2474_s21, %s407_s15  }
  0x55   : > { %p2882_p5 = scmp.ne.s32.totalorder %s2875_s16, 0 }
  0x56   : > { %s2504_s13 = sand.u32 (!%p2882_p5), 1, %s2277_s26   ;;  %p2883_p0 = scmp.ne.s32.totalorder (!%p2882_p5), %s2872_s14, 0 }
  0x57   : > { %426 = sbr.rel (%p2882_p5) target bundleno = 4807 (0x12c7), region = 64  ;;  %s1772_s23 = sshll.u32 (!%p2882_p5), %s2504_s13, 3 }
  0x58   : > { %s429_s17 = scalar_lea.sflag (!%p2882_p5), [#allocation3], %s2504_s13  ;;  %s432_s19 = scalar_lea.vmem (!%p2882_p5), [#allocation2], %s1772_s23 }
  0x5e   : > { %2256 = dma.done.wait (%p2883_p0), %s429_s17, 128  }
  0x5f   : > { %2258 = vsyncadd (%p2883_p0), %s429_s17, 4294967168  ;;  %p2884_p11 = scmp.eq.s32.totalorder %s2389_s29, 0 }
  0x61   : > { %2260 = dma.done.wait (%p2884_p11), [#allocation6], 512   ;;  %p2885_p1 = pmov %p2884_p11 }
  0x62   : > { %v2291_v0 = vmov 0.0|0.0   ;;  %vm2292_vm0 = vmmov 0   ;;  %v2293_v1 = vmov 0.0   ;;  %s2886_s1 = sld [smem:[#allocation18_spill]]  ;;  %v494_v8 = vld [vmem:[%s432_s19] sm:$0xff]  ;;  %vm500_vm1 = vcmask 261120  }
  0x63   : > { %2262 = vsyncadd (%p2885_p1), [#allocation6], 4294966784  ;;  %1980 = vmatprep.subr.bf16.mxu1 %v2291_v0  ;;  %1864 = vmatprep.mubr.msk.f32.mxu1 %vm2292_vm0, %v2293_v1  ;;  %s2294_s10 = smov 96   ;;  %vm652_vm2 = vcmask 64512   ;;  %s2295_s12 = smov 64   ;;  %v924_v49 = vld [vmem:[%s2845_s4] sm:$0xff]  ;;  %v832_v60 = vlaneseq }
  0x64   : > { %1986 = vmatprep.subr.bf16.mxu0 %v2291_v0  ;;  %1885 = vmatprep.mubr.msk.f32.mxu0 %vm2292_vm0, %v2293_v1  ;;  %s2887_s2 = sld [smem:[#allocation19_spill]]  ;;  %s2571_s30 = scalar_lea.vmem [#allocation7], %s1772_s23  ;;  %v925_v50 = vld [vmem:[%s2845_s4 + $0x8] sm:$0xff]  ;;  %v926_v51 = vld [vmem:[%s2845_s4 + $0x10] sm:$0xff]  ;;  %v927_v53 = vld [vmem:[%s2845_s4 + $0x18] sm:$0xff]  ;;  %vm936_vm3 = vcmask 523264  }
  0x65   : > { %s2888_s3 = sld [smem:[#allocation20_spill]]  ;;  %v1999_v52 = vpack.c.bf16 %v925_v50, %v924_v49  ;;  %v2002_v54 = vpack.c.bf16 %v927_v53, %v926_v51  ;;  %v928_v55 = vld [vmem:[%s2845_s4 + $0x20] sm:$0xff]  ;;  %v929_v56 = vld [vmem:[%s2845_s4 + $0x28] sm:$0xff]  ;;  %v2614_v62 = vshrl.u32 %v832_v60, 7  ;;  %p489_p4 = scmp.lt.s32.totalorder %s2389_s29, 1  ;;  %vm1194_vm4 = vcmask 9216  }
  0x66   : > { %v2005_v57 = vpack.c.bf16 %v929_v56, %v928_v55  ;;  %vm1212_vm5 = vcmask 1041408   ;;  %vm1208_vm6 = vcmask 15360   ;;  %vm1366_vm7 = vcmask 261126   ;;  %s2889_s18 = sld [smem:[#allocation21_spill]]  ;;  %s1615_s21 = sshll.u32 %s2571_s30, 4  ;;  %s1616_s21 = int_to_ptr.vmem [resolvable:$true] %s1615_s21 }
  0x67   : > { %v834_v63 = vsub.s32 2, %v2614_v62  ;;  %s490_s14 = scalar_select %p489_p4, %s2389_s29, 1 }
  0x68   : > { %v496_v2 = vld [vmem:[%s2886_s1] sm:$0xff]  ;;  %v497_v3 = vld [vmem:[%s2886_s1 + $0x8] sm:$0xff]  ;;  %v498_v4 = vld [vmem:[%s2886_s1 + $0x10] sm:$0xff]  ;;  %s2890_s23 = sld [smem:[#allocation22_spill]]  ;;  %s1594_s17 = scalar_lea.sflag [#allocation4], %s2504_s13 }
  0x69   : > { %v1981_v5 = vpack.c.bf16 %v497_v3, %v496_v2  ;;  %v499_v6 = vld [vmem:[%s2886_s1 + $0x18] sm:$0xff]  ;;  %v495_v2 = vld [vmem:[%s2846_s5] sm:$0x3f]  ;;  %v839_v3 = vsub.s32 3, %v2614_v62  ;;  %s1799_s16 = sshll.u32 %s490_s14, 4  ;;  %s2183_s19 = scalar_lea.vmem %s1616_s21, 128 }
  0x6a   : > { %v1984_v7 = vpack.c.bf16 %v499_v6, %v498_v4  ;;  %v740_v21 = vld [vmem:[%s2887_s2] sm:$0xff]  ;;  %v741_v22 = vld [vmem:[%s2887_s2 + $0x8] sm:$0xff]  ;;  %v742_v23 = vld [vmem:[%s2887_s2 + $0x10] sm:$0xff]  ;;  %v835_v4 = vrot.slane %v495_v2, %v834_v63  ;;  %s2671_s22 = scalar_lea.vmem %s2852_s11, %s1799_s16  ;;  %p2184_p6 = scmp.ne.s32.totalorder %s1616_s21, %s2183_s19 }
  0x6b   : > { %1982 = vmatpush3.bf16.msra.mxu1 %v1981_v5  ;;  %v1987_v24 = vpack.c.bf16 %v741_v22, %v740_v21  ;;  %v743_v25 = vld [vmem:[%s2887_s2 + $0x18] sm:$0xff]  ;;  %v842_v43 = vld [vmem:[%s2888_s3] sm:$0xff]  ;;  %v843_v44 = vld [vmem:[%s2888_s3 + $0x8] sm:$0xff]  ;;  %s2296_s14 = smov [#allocation7]  }
  0x6c   : > { %1983 = vmatprep.subr.bf16.mxu1 %v2291_v0  ;;  %v1990_v26 = vpack.c.bf16 %v743_v25, %v742_v23  ;;  %v1993_v45 = vpack.c.bf16 %v843_v44, %v842_v43  ;;  %v844_v46 = vld [vmem:[%s2888_s3 + $0x10] sm:$0xff]  ;;  %v845_v47 = vld [vmem:[%s2888_s3 + $0x18] sm:$0xff]  ;;  %p2185_p8 = pnand %p2184_p6, %p2459_p12  ;;  %s2187_s16 = sshll.u32 %s2296_s14, 4  ;;  %s2188_s16 = int_to_ptr.vmem [resolvable:$false] %s2187_s16 }
  0x6d   : > { %1988 = vmatpush3.bf16.msra.mxu0 %v1987_v24  ;;  %v1996_v48 = vpack.c.bf16 %v845_v47, %v844_v46  ;;  %s2189_s0 = scalar_lea.vmem %s2188_s16, 256  ;;  %p2190_p13 = scmp.lt.s32.totalorder %s1616_s21, %s2188_s16 }
  0x6e   : > { %1989 = vmatprep.subr.bf16.mxu0 %v2291_v0  ;;  %p2186_p10 = pneg %p2185_p8  ;;  %p2191_p3 = scmp.lt.s32.totalorder %s2189_s0, %s2183_s19 }
  0x6f   : > { %1985 = vmatpush3.bf16.msra.mxu1 %v1984_v7  ;;  %v840_v7 = vrot.slane %v495_v2, %v839_v3 }
  0x70   : > { %1867 = vmatprep.subr.mxu1 %v2293_v1  ;;  %p2192_p7 = por %p2191_p3, %p2190_p13 }
  0x71   : > { %1991 = vmatpush3.bf16.msra.mxu0 %v1990_v26 }
  0x72   : > { %1865 = vmatmul.mubr.msk.f32.vlgmr.msra.gmra.mrb[0].mxu1 %vm500_vm1, %v494_v8  ;;  %1998 = vmatprep.subr.bf16.mxu0 %v2291_v0  ;;  %p2193_p9 = pnand %p2192_p7, %p2186_p10 }
  0x73   : > { %1869 = vmatprep.mubr.msk.f32.mxu1 %vm2292_vm0, %v2293_v1 }
 0x145   : > { %v570_v9 = vpop.f32.mrb[0].mxu1 }
 0x146   : > { %575 = vrot.lane.b32.xlu0 %v570_v9, %s2294_s10  ;;  %v1866_v10 = vpop.f32.mrb[1].mxu1 }
 0x147   : > { %v930_v10 = vld [vmem:[%s2845_s4 + $0x30] sm:$0xff] }
 0x1b8   : > { %v576_v11 = vpop.permute.xlu0 %575 }
 0x1b9   : > { %1868 = vmatpush3.xpose.msk.msra.mxu1 %vm500_vm1, %v576_v11  ;;  %v931_v11 = vld [vmem:[%s2845_s4 + $0x38] sm:$0xff] }
 0x1ba   : > { %1872 = vmatprep.subr.mxu1 %v2293_v1 }
 0x1bc   : > { %1870 = vmatmul.mubr.msk.f32.vlgmr.msra.gmra.mrb[2].mxu1 %vm500_vm1, %v570_v9 }
 0x1bd   : > { %1874 = vmatprep.mubr.msk.f32.mxu1 %vm2292_vm0, %v2293_v1 }
 0x28f   : > { %v647_v12 = vpop.f32.mrb[2].mxu1 }
 0x290   : > { %v651_v13 = vmul.f32 0.17677669, %v647_v12  ;;  %v1871_v14 = vpop.f32.mrb[3].mxu1  ;;  %v2008_v12 = vpack.c.bf16 %v931_v11, %v930_v10 }
 0x292   : > { %v653_v15 = vsel %vm652_vm2, %v651_v13, -inf }
 0x293   : > { %654 = vmax.xlane.f32.xlu0 %v653_v15 }
 0x320   : > { %v655_v16 = vpop.xlane.xlu0 %654 }
 0x321   : > { %v656_v17 = vsub.f32 %v651_v13, %v655_v16  ;;  %v848_v13 = vsub.s32 0, %v2614_v62 }
 0x323   : > { %v657_v18 = vmul.f32 1.442695, %v656_v17  ;;  %v849_v14 = vrot.slane %v495_v2, %v848_v13 }
 0x325   : > { %2109 = vpow2.f32 %v657_v18 }
 0x32f   : > { %v2110_v19 = vpop.eup %2109 }
 0x330   : > { %v659_v20 = vsel %vm652_vm2, %v2110_v19, 0.0 }
 0x331   : > { %660 = vadd.xlane.f32.xlu1 %v659_v20 }
 0x342   : > { %664 = vrot.lane.b32.xlu1 %v570_v9, %s2295_s12 }
 0x3be   : > { %v661_v27 = vpop.xlane.xlu1 %660 }
 0x3bf   : > { %2111 = vrcp.f32 %v661_v27 }
 0x3c2   : > { %v665_v28 = vpop.permute.xlu1 %664 }
 0x3c3   : > { %1873 = vmatpush3.msra.mxu1 %v665_v28 }
 0x3c4   : > { %1992 = vmatprep.subr.bf16.mxu1 %v2291_v0 }
 0x3c9   : > { %v2112_v29 = vpop.eup %2111 }
 0x3ca   : > { %v663_v30 = vmul.f32 %v2112_v29, %v2110_v19  ;;  %v934_v19 = vsub.s32 1, %v2614_v62 }
 0x3cc   : > { %1875 = vmatmul.mubr.msk.f32.vlgmr.msra.gmra.mrb[4].mxu1 %vm652_vm2, %v663_v30  ;;  %v1035_v31 = vsel %vm652_vm2, %v663_v30, 0.0  ;;  %v935_v20 = vrot.slane %v495_v2, %v934_v19 }
 0x3cd   : > { %1896 = vmatprep.mubr.msk.f32.mxu1 %vm2292_vm0, %v2293_v1  ;;  %1036 = vst [vmem:[%s2571_s30] sm:$0xff] %v1035_v31  ;;  %1994 = vmatpush3.bf16.msra.mxu1 %v1993_v45  ;;  %v1038_v31 = vld [vmem:[%s2847_s6] sm:$0xff] }
 0x3ce   : > { %1995 = vmatprep.subr.bf16.mxu1 %v2291_v0 }
 0x3d1   : > { %1997 = vmatpush3.bf16.msra.mxu1 %v1996_v48 }
 0x3d2   : > { %2010 = vmatprep.subr.bf16.mxu1 %v2291_v0 }
 0x49f   : > { %v736_v32 = vpop.f32.mrb[4].mxu1 }
 0x4a0   : > { %v1876_v33 = vpop.f32.mrb[5].mxu1  ;;  %1886 = vmatmul.mubr.msk.f32.vlgmr.msra.gmra.mrb[0].mxu0 %vm500_vm1, %v736_v32  ;;  %v1039_v32 = vld [vmem:[%s2847_s6 + $0x8] sm:$0xff] }
 0x4a1   : > { %1915 = vmatprep.mubr.msk.f32.mxu0 %vm2292_vm0, %v2293_v1  ;;  %2000 = vmatpush3.bf16.msra.mxu0 %v1999_v52  ;;  %v2011_v33 = vpack.c.bf16 %v1039_v32, %v1038_v31  ;;  %v1473_v32 = vld [vmem:[%s2850_s9] sm:$0xff] }
 0x4a2   : > { %2001 = vmatprep.subr.bf16.mxu0 %v2291_v0 }
 0x4a5   : > { %2003 = vmatpush3.bf16.msra.mxu0 %v2002_v54 }
 0x4a6   : > { %2004 = vmatprep.subr.bf16.mxu0 %v2291_v0 }
 0x4a9   : > { %2006 = vmatpush3.bf16.msra.mxu0 %v2005_v57 }
 0x4aa   : > { %2007 = vmatprep.subr.bf16.mxu0 %v2291_v0 }
 0x4ad   : > { %2009 = vmatpush3.bf16.msra.mxu0 %v2008_v12 }
 0x4ae   : > { %2016 = vmatprep.subr.bf16.mxu0 %v2291_v0 }
 0x573   : > { %v813_v34 = vpop.f32.mrb[0].mxu0 }
 0x574   : > { %v817_v35 = vadd.f32 %v813_v34, %v494_v8  ;;  %v1887_v36 = vpop.f32.mrb[1].mxu0  ;;  %v1040_v34 = vld [vmem:[%s2847_s6 + $0x10] sm:$0xff] }
 0x576   : > { %v818_v37 = vsel %vm500_vm1, %v817_v35, 0.0 }
 0x577   : > { %819 = vadd.xlane.f32.xlu1 %v818_v37 }
 0x604   : > { %v820_v38 = vpop.xlane.xlu1 %819 }
 0x605   : > { %v822_v39 = vmul.f32 0.03125, %v820_v38 }
 0x607   : > { %v823_v40 = vsub.f32 %v817_v35, %v822_v39  ;;  %v1041_v35 = vld [vmem:[%s2847_s6 + $0x18] sm:$0xff] }
 0x608   : > { %v2014_v36 = vpack.c.bf16 %v1041_v35, %v1040_v34  ;;  %v1475_v34 = vld [vmem:[%s2850_s9 + $0x10] sm:$0xff] }
 0x609   : > { %v824_v41 = vmul.f32 %v823_v40, %v823_v40 }
 0x60b   : > { %v825_v42 = vsel %vm500_vm1, %v824_v41, 0.0  ;;  %v1031_v41 = vsub.s32 5, %v2614_v62 }
 0x60c   : > { %826 = vadd.xlane.f32.xlu0 %v825_v42 }
 0x60d   : > { %v1032_v45 = vrot.slane %v495_v2, %v1031_v41 }
 0x699   : > { %v827_v58 = vpop.xlane.xlu0 %826 }
 0x69a   : > { %v828_v59 = vmul.f32 0.03125, %v827_v58 }
 0x69c   : > { %v829_v61 = vadd.f32 1e-05, %v828_v59 }
 0x69e   : > { %2113 = vrsqrt.f32 %v829_v61  ;;  %v1285_v61 = vld [vmem:[%s2848_s7] sm:$0xff] }
 0x6a8   : > { %v2114_v5 = vpop.eup %2113 }
 0x6a9   : > { %v831_v6 = vmul.f32 %v2114_v5, %v823_v40  ;;  %v1026_v40 = vsub.s32 4, %v2614_v62 }
 0x6ab   : > { %v836_v8 = vmul.f32 %v835_v4, %v831_v6  ;;  %v1027_v42 = vrot.slane %v495_v2, %v1026_v40  ;;  %v1286_v2 = vld [vmem:[%s2848_s7 + $0x8] sm:$0xff]  ;;  %v1287_v4 = vld [vmem:[%s2848_s7 + $0x10] sm:$0xff]  ;;  %v1288_v6 = vld [vmem:[%s2848_s7 + $0x18] sm:$0xff] }
 0x6ac   : > { %v2017_v5 = vpack.c.bf16 %v1286_v2, %v1285_v61 }
 0x6ad   : > { %v841_v9 = vadd.f32 %v840_v7, %v836_v8  ;;  %v2020_v7 = vpack.c.bf16 %v1288_v6, %v1287_v4 }
 0x6af   : > { %1897 = vmatmul.mubr.msk.f32.vlgmr.msra.gmra.mrb[6].mxu1 %vm500_vm1, %v841_v9 }
 0x6b0   : > { %1926 = vmatprep.mubr.msk.f32.mxu1 %vm2292_vm0, %v2293_v1  ;;  %2012 = vmatpush3.bf16.msra.mxu1 %v2011_v33  ;;  %v1474_v33 = vld [vmem:[%s2850_s9 + $0x8] sm:$0xff] }
 0x6b1   : > { %2013 = vmatprep.subr.bf16.mxu1 %v2291_v0  ;;  %v2029_v35 = vpack.c.bf16 %v1474_v33, %v1473_v32 }
 0x6b4   : > { %2015 = vmatpush3.bf16.msra.mxu1 %v2014_v36  ;;  %v1476_v36 = vld [vmem:[%s2850_s9 + $0x18] sm:$0xff] }
 0x6b5   : > { %1929 = vmatprep.subr.mxu1 %v2293_v1 }
 0x782   : > { %v919_v15 = vpop.f32.mrb[6].mxu1 }
 0x783   : > { %v920_v16 = vadd.f32 %v919_v15, %v849_v14  ;;  %v1898_v17 = vpop.f32.mrb[7].mxu1 }
 0x785   : > { %v923_v18 = vmax.f32 %v920_v16, 0.0 }
 0x787   : > { %1916 = vmatmul.mubr.msk.f32.vlgmr.msra.gmra.mrb[2].mxu0 %vm936_vm3, %v923_v18 }
 0x788   : > { %1947 = vmatprep.mubr.msk.f32.mxu0 %vm2292_vm0, %v2293_v1  ;;  %2018 = vmatpush3.bf16.msra.mxu0 %v2017_v5 }
 0x789   : > { %2019 = vmatprep.subr.bf16.mxu0 %v2291_v0 }
 0x78c   : > { %2021 = vmatpush3.bf16.msra.mxu0 %v2020_v7 }
 0x78d   : > { %2028 = vmatprep.subr.bf16.mxu0 %v2291_v0 }
 0x85a   : > { %v1006_v21 = vpop.f32.mrb[2].mxu0 }
 0x85b   : > { %v1007_v22 = vadd.f32 %v1006_v21, %v935_v20  ;;  %v1917_v23 = vpop.f32.mrb[3].mxu0 }
 0x85d   : > { %v1010_v24 = vadd.f32 %v1007_v22, %v841_v9 }
 0x85f   : > { %v1011_v25 = vsel %vm500_vm1, %v1010_v24, 0.0 }
 0x860   : > { %1012 = vadd.xlane.f32.xlu0 %v1011_v25 }
 0x8ed   : > { %v1013_v26 = vpop.xlane.xlu0 %1012 }
 0x8ee   : > { %v1014_v27 = vmul.f32 0.03125, %v1013_v26 }
 0x8f0   : > { %v1015_v28 = vsub.f32 %v1010_v24, %v1014_v27  ;;  %v1390_v27 = vld [vmem:[#allocation5] sm:$0xff] }
 0x8f2   : > { %v1016_v29 = vmul.f32 %v1015_v28, %v1015_v28 }
 0x8f4   : > { %v1017_v30 = vsel %vm500_vm1, %v1016_v29, 0.0 }
 0x8f5   : > { %1018 = vadd.xlane.f32.xlu0 %v1017_v30  ;;  %v1393_v30 = vld [vmem:[#allocation5 + $0x18] sm:$0xff] }
 0x982   : > { %v1019_v37 = vpop.xlane.xlu0 %1018 }
 0x983   : > { %v1020_v38 = vmul.f32 0.03125, %v1019_v37  ;;  %v2032_v37 = vpack.c.bf16 %v1476_v36, %v1475_v34 }
 0x985   : > { %v1021_v39 = vadd.f32 1e-05, %v1020_v38  ;;  %v1477_v38 = vld [vmem:[%s2850_s9 + $0x20] sm:$0xff] }
 0x987   : > { %2115 = vrsqrt.f32 %v1021_v39  ;;  %v1478_v39 = vld [vmem:[%s2850_s9 + $0x28] sm:$0xff] }
 0x991   : > { %v2116_v43 = vpop.eup %2115 }
 0x992   : > { %v1023_v44 = vmul.f32 %v2116_v43, %v1015_v28  ;;  %v1391_v28 = vld [vmem:[#allocation5 + $0x8] sm:$0xff] }
 0x993   : > { %v2023_v29 = vpack.c.bf16 %v1391_v28, %v1390_v27 }
 0x994   : > { %v1028_v46 = vmul.f32 %v1027_v42, %v1023_v44  ;;  %v2035_v42 = vpack.c.bf16 %v1478_v39, %v1477_v38 }
 0x996   : > { %v1033_v47 = vadd.f32 %v1032_v45, %v1028_v46  ;;  %v2736_v46 = vld [vmem:[%s2889_s18] sm:$0x3f] }
 0x998   : > { %1034 = vst.msk [vmem:[%s2671_s22] sm:$0xff] %vm500_vm1, %v1033_v47  ;;  %v1043_v48 = vrot.slane %v1033_v47, 6 }
 0x99a   : > { %1927 = vmatmul.mubr.msk.f32.vlgmr.msra.gmra.mrb[8].mxu1 %vm500_vm1, %v1043_v48 }
 0x99b   : > { %1931 = vmatprep.mubr.msk.f32.mxu1 %vm2292_vm0, %v2293_v1 }
 0xa6d   : > { %v1112_v49 = vpop.f32.mrb[8].mxu1 }
 0xa6e   : > { %1117 = vrot.lane.b32.xlu0 %v1112_v49, %s2294_s10  ;;  %v1928_v50 = vpop.f32.mrb[9].mxu1 }
 0xa6f   : > { %v1388_v50 = vrot.slane %v2736_v46, %v839_v3 }
 0xae0   : > { %v1118_v51 = vpop.permute.xlu0 %1117 }
 0xae1   : > { %1930 = vmatpush3.xpose.msk.msra.mxu1 %vm500_vm1, %v1118_v51 }
 0xae2   : > { %1934 = vmatprep.subr.mxu1 %v2293_v1 }
 0xae4   : > { %1932 = vmatmul.mubr.msk.f32.vlgmr.msra.gmra.mrb[10].mxu1 %vm500_vm1, %v1112_v49 }
 0xae5   : > { %1936 = vmatprep.mubr.msk.f32.mxu1 %vm2292_vm0, %v2293_v1 }
 0xbb7   : > { %v1189_v52 = vpop.f32.mrb[10].mxu1 }
 0xbb8   : > { %v1193_v53 = vmul.f32 0.17677669, %v1189_v52  ;;  %v1933_v54 = vpop.f32.mrb[11].mxu1 }
 0xbb9   : > { %v1480_v54 = vld [vmem:[%s2850_s9 + $0x38] sm:$0xff] }
 0xbba   : > { %v1195_v55 = vsel %vm1194_vm4, %v1193_v53, -inf }
 0xbbb   : > { %1196 = vmax.xlane.f32.xlu1 %v1195_v55  ;;  %v1397_v55 = vrot.slane %v2736_v46, %v848_v13 }
 0xc48   : > { %v1197_v56 = vpop.xlane.xlu1 %1196 }
 0xc49   : > { %v1198_v57 = vsub.f32 %v1193_v53, %v1197_v56  ;;  %v1479_v53 = vld [vmem:[%s2850_s9 + $0x30] sm:$0xff] }
 0xc4b   : > { %v1199_v58 = vmul.f32 1.442695, %v1198_v57 }
 0xc4d   : > { %2117 = vpow2.f32 %v1199_v58 }
 0xc57   : > { %v2118_v59 = vpop.eup %2117 }
 0xc58   : > { %v1201_v60 = vsel %vm1194_vm4, %v2118_v59, 0.0 }
 0xc59   : > { %1202 = vadd.xlane.f32.xlu1 %v1201_v60 }
 0xc6a   : > { %1206 = vrot.lane.b32.xlu1 %v1112_v49, %s2295_s12  ;;  %s1775_s12 = sshll.u32 %s2504_s13, 1 }
 0xc6b   : > { %s2703_s25 = scalar_lea.vmem [#allocation8], %s1775_s12  ;;  %s1795_s12 = sshll.u32 %s2389_s29, 7 }
 0xc6c   : > { %s2769_s18 = scalar_lea.hbm %s2890_s23, %s1795_s12 }
 0xce6   : > { %v1203_v8 = vpop.xlane.xlu1 %1202 }
 0xce7   : > { %2119 = vrcp.f32 %v1203_v8 }
 0xcea   : > { %v1207_v9 = vpop.permute.xlu1 %1206 }
 0xceb   : > { %1935 = vmatpush3.msk.msra.mxu1 %vm1212_vm5, %v1207_v9 }
 0xcec   : > { %2022 = vmatprep.subr.bf16.mxu1 %v2291_v0 }
 0xcf1   : > { %v2120_v10 = vpop.eup %2119 }
 0xcf2   : > { %v1205_v11 = vmul.f32 %v2120_v10, %v2118_v59  ;;  %v1484_v59 = vrot.slane %v2736_v46, %v934_v19 }
 0xcf4   : > { %1937 = vmatmul.mubr.msk.f32.vlgmr.msra.gmra.mrb[12].mxu1 %vm1208_vm6, %v1205_v11  ;;  %v1586_v12 = vsel %vm1208_vm6, %v1205_v11, 0.0 }
 0xcf5   : > { %1958 = vmatprep.mubr.msk.f32.mxu1 %vm2292_vm0, %v2293_v1  ;;  %1587 = vst [vmem:[%s2703_s25] sm:$0x3] %v1586_v12  ;;  %2024 = vmatpush3.bf16.msra.mxu1 %v2023_v29 }
 0xcf6   : > { %2025 = vmatprep.subr.bf16.mxu1 %v2291_v0 }
 0xdc7   : > { %v1281_v14 = vpop.f32.mrb[12].mxu1 }
 0xdc8   : > { %v1938_v15 = vpop.f32.mrb[13].mxu1  ;;  %1948 = vmatmul.mubr.msk.f32.vlgmr.msra.gmra.mrb[4].mxu0 %vm500_vm1, %v1281_v14 }
 0xdc9   : > { %1977 = vmatprep.mubr.msk.f32.mxu0 %vm2292_vm0, %v2293_v1  ;;  %v1392_v1 = vld [vmem:[#allocation5 + $0x10] sm:$0xff]  ;;  %2030 = vmatpush3.bf16.msra.mxu0 %v2029_v35 }
 0xdca   : > { %v2026_v31 = vpack.c.bf16 %v1393_v30, %v1392_v1  ;;  %2031 = vmatprep.subr.bf16.mxu0 %v2291_v0 }
 0xdcc   : > { %2027 = vmatpush3.bf16.msra.mxu1 %v2026_v31 }
 0xdcd   : > { %2033 = vmatpush3.bf16.msra.mxu0 %v2032_v37 }
 0xdce   : > { %2034 = vmatprep.subr.bf16.mxu0 %v2291_v0 }
 0xdd1   : > { %2036 = vmatpush3.bf16.msra.mxu0 %v2035_v42 }
 0xdd2   : > { %2037 = vmatprep.subr.bf16.mxu0 %v2291_v0 }
 0xe9b   : > { %v1358_v16 = vpop.f32.mrb[4].mxu0 }
 0xe9c   : > { %v1363_v17 = vrot.slane %v1358_v16, 2  ;;  %v1949_v18 = vpop.f32.mrb[5].mxu0 }
 0xe9e   : > { %v1365_v20 = vadd.f32 %v1363_v17, %v1033_v47  ;;  %v1383_v47 = vrot.slane %v2736_v46, %v834_v63  ;;  %v2038_v63 = vpack.c.bf16 %v1480_v54, %v1479_v53 }
 0xea0   : > { %v1367_v21 = vsel %vm1366_vm7, %v1365_v20, 0.0  ;;  %2039 = vmatpush3.bf16.msra.mxu0 %v2038_v63 }
 0xea1   : > { %1368 = vadd.xlane.f32.xlu0 %v1367_v21 }
 0xf2e   : > { %v1369_v22 = vpop.xlane.xlu0 %1368 }
 0xf2f   : > { %v1370_v23 = vmul.f32 0.03125, %v1369_v22 }
 0xf31   : > { %v1371_v24 = vsub.f32 %v1365_v20, %v1370_v23 }
 0xf33   : > { %v1372_v25 = vmul.f32 %v1371_v24, %v1371_v24 }
 0xf35   : > { %v1373_v26 = vsel %vm1366_vm7, %v1372_v25, 0.0 }
 0xf36   : > { %1374 = vadd.xlane.f32.xlu1 %v1373_v26 }
 0xfc3   : > { %v1375_v43 = vpop.xlane.xlu1 %1374 }
 0xfc4   : > { %v1376_v44 = vmul.f32 0.03125, %v1375_v43 }
 0xfc6   : > { %v1377_v45 = vadd.f32 1e-05, %v1376_v44 }
 0xfc8   : > { %2121 = vrsqrt.f32 %v1377_v45 }
 0xfd2   : > { %v2122_v48 = vpop.eup %2121 }
 0xfd3   : > { %v1379_v49 = vmul.f32 %v2122_v48, %v1371_v24 }
 0xfd5   : > { %v1384_v0 = vmul.f32 %v1383_v47, %v1379_v49 }
 0xfd7   : > { %v1389_v51 = vadd.f32 %v1388_v50, %v1384_v0 }
 0xfd9   : > { %v1399_v52 = vrot.slane %v1389_v51, 6 }
 0xfdb   : > { %1959 = vmatmul.mubr.msk.f32.vlgmr.msra.gmra.mrb[14].mxu1 %vm500_vm1, %v1399_v52 }
0x10ae   : > { %v1468_v3 = vpop.f32.mrb[14].mxu1 }
0x10af   : > { %v1469_v56 = vadd.f32 %v1468_v3, %v1397_v55  ;;  %v1960_v57 = vpop.f32.mrb[15].mxu1 }
0x10b1   : > { %v1472_v58 = vmax.f32 %v1469_v56, 0.0 }
0x10b3   : > { %1978 = vmatmul.mubr.msk.f32.vlgmr.msra.gmra.mrb[6].mxu0 %vm936_vm3, %v1472_v58 }
0x1186   : > { %v1554_v60 = vpop.f32.mrb[6].mxu0 }
0x1187   : > { %v1555_v61 = vadd.f32 %v1554_v60, %v1484_v59  ;;  %v1979_v2 = vpop.f32.mrb[7].mxu0 }
0x1189   : > { %v1559_v4 = vrot.slane %v1555_v61, 2 }
0x118b   : > { %v1561_v5 = vadd.f32 %v1559_v4, %v1389_v51 }
0x118d   : > { %v1562_v13 = vsel %vm1366_vm7, %v1561_v5, 0.0 }
0x118e   : > { %1563 = vadd.xlane.f32.xlu0 %v1562_v13 }
0x121b   : > { %v1564_v6 = vpop.xlane.xlu0 %1563 }
0x121c   : > { %v1565_v7 = vmul.f32 0.03125, %v1564_v6 }
0x121e   : > { %v2759_v8 = vsub.f32 %v1561_v5, %v1565_v7 }
0x1220   : > { %v1567_v9 = vmul.f32 %v2759_v8, %v2759_v8 }
0x1222   : > { %v1568_v10 = vsel %vm1366_vm7, %v1567_v9, 0.0 }
0x1223   : > { %1569 = vadd.xlane.f32.xlu0 %v1568_v10 }
0x1224   : > { %2196 = shalt.err (!%p2193_p9)
}
0x1225   : > { %s2197_s30 = scalar_lea.hbm %s2769_s18, 128  ;;  %s2201_s15 = scalar_lea.hbm %s2890_s23, 256 }
0x1226   : > { %p2198_p2 = scmp.ne.s32.totalorder %s2769_s18, %s2197_s30  ;;  %p2202_p11 = scmp.lt.u32.totalorder %s2769_s18, %s2890_s23 }
0x1227   : > { %p2203_p1 = scmp.lt.u32.totalorder %s2201_s15, %s2197_s30  ;;  %p2205_p6 = scmp.lt.u32.totalorder %s2197_s30, %s2769_s18 }
0x1228   : > { %p2199_p5 = pnand %p2198_p2, %p2459_p12 }
0x1229   : > { %p2204_p4 = por %p2203_p1, %p2202_p11 }
0x122a   : > { %p2200_p0 = pneg %p2199_p5 }
0x122b   : > { %p2206_p8 = por %p2205_p6, %p2204_p4 }
0x122d   : > { %p2207_p10 = pnand %p2206_p8, %p2200_p0 }
0x122f   : > { %2210 = shalt.err (!%p2207_p10)
}
0x1230   : > { %2046 = dma.vmem_to_hbm [thread:$0]  (%p2459_p12), %s1616_s21, 128, %s2769_s18, %s1594_s17  }
0x1231   : > { %s1796_s0 = sshll.u32 %s2389_s29, 5  ;;  %s1628_s19 = sshll.u32 %s2703_s25, 4  ;;  %s1629_s19 = int_to_ptr.vmem [resolvable:$true] %s1628_s19 }
0x1232   : > { %s2891_s14 = sld [smem:[#allocation23_spill]]  ;;  %s1599_s30 = scalar_lea.sflag [#allocation9], %s2504_s13 }
0x1233   : > { %s2211_s15 = scalar_lea.vmem %s1629_s19, 32  ;;  %s2297_s1 = smov [#allocation8]  }
0x1234   : > { %p2212_p13 = scmp.ne.s32.totalorder %s1629_s19, %s2211_s15  ;;  %s2215_s2 = sshll.u32 %s2297_s1, 4  ;;  %s2216_s2 = int_to_ptr.vmem [resolvable:$false] %s2215_s2 }
0x1235   : > { %s2217_s3 = scalar_lea.vmem %s2216_s2, 64  ;;  %p2218_p9 = scmp.lt.s32.totalorder %s1629_s19, %s2216_s2 }
0x1236   : > { %p2213_p3 = pnand %p2212_p13, %p2459_p12  ;;  %p2219_p2 = scmp.lt.s32.totalorder %s2217_s3, %s2211_s15 }
0x1238   : > { %s2794_s16 = scalar_lea.hbm %s2891_s14, %s1796_s0  ;;  %p2214_p7 = pneg %p2213_p3 }
0x1239   : > { %p2220_p5 = por %p2219_p2, %p2218_p9 }
0x123b   : > { %p2221_p0 = pnand %p2220_p5, %p2214_p7 }
0x123d   : > { %2224 = shalt.err (!%p2221_p0)
}
0x123e   : > { %s2225_s29 = scalar_lea.hbm %s2794_s16, 32  ;;  %s2229_s1 = scalar_lea.hbm %s2891_s14, 64 }
0x123f   : > { %p2226_p11 = scmp.ne.s32.totalorder %s2794_s16, %s2225_s29  ;;  %p2230_p6 = scmp.lt.u32.totalorder %s2794_s16, %s2891_s14 }
0x1240   : > { %p2231_p8 = scmp.lt.u32.totalorder %s2229_s1, %s2225_s29  ;;  %p2233_p13 = scmp.lt.u32.totalorder %s2225_s29, %s2794_s16 }
0x1241   : > { %p2227_p1 = pnand %p2226_p11, %p2459_p12 }
0x1242   : > { %p2232_p10 = por %p2231_p8, %p2230_p6 }
0x1243   : > { %p2228_p4 = pneg %p2227_p1 }
0x1244   : > { %p2234_p3 = por %p2233_p13, %p2232_p10 }
0x1246   : > { %p2235_p7 = pnand %p2234_p3, %p2228_p4 }
0x1248   : > { %2238 = shalt.err (!%p2235_p7)
}
0x1249   : > { %2047 = dma.vmem_to_hbm [thread:$0]  (%p2459_p12), %s1629_s19, 32, %s2794_s16, %s1599_s30   ;;  %v1578_v14 = vrot.slane %v2736_v46, %v1026_v40  ;;  %v1583_v16 = vrot.slane %v2736_v46, %v1031_v41 }
0x12b0   : > { %v1570_v19 = vpop.xlane.xlu0 %1569 }
0x12b1   : > { %v1571_v11 = vmul.f32 0.03125, %v1570_v19 }
0x12b3   : > { %v1572_v12 = vadd.f32 1e-05, %v1571_v11 }
0x12b5   : > { %2123 = vrsqrt.f32 %v1572_v12 }
0x12bf   : > { %v2124_v15 = vpop.eup %2123 }
0x12c0   : > { %v1574_v17 = vmul.f32 %v2124_v15, %v2759_v8 }
0x12c2   : > { %v1579_v18 = vmul.f32 %v1578_v14, %v1574_v17 }
0x12c4   : > { %v1584_v20 = vadd.f32 %v1583_v16, %v1579_v18 }
0x12c6   : > { %1585 = vst.msk [vmem:[%s2671_s22 + $0x2] sm:$0xc0] %vm1366_vm7, %v1584_v20 }
0x12c7 PF: > { %s2892_s3 = sld [smem:[#allocation14_spill]]  ;;  %s2893_s24 = sld [smem:[#allocation15_spill]] }
0x12c8   : > { %p2895_p9 = scmp.ge.s32.totalorder %s2285_s28, 2 }
0x12cd   : > { %s1648_s18 = sand.u32 1, %s2892_s3   ;;  %p2894_p12 = scmp.ne.s32.totalorder %s2893_s24, 0 }
0x12ce   : > { %s1649_s17 = scalar_lea.sflag [#allocation4], %s1648_s18 }
0x12cf   : > { %p2059_p2 = pnand %p2895_p9, %p2894_p12 }
0x12d1   : > { %2264 = dma.done.wait (!%p2059_p2), %s1649_s17, 128  }
0x12d2   : > { %2266 = vsyncadd (!%p2059_p2), %s1649_s17, 4294967168  ;;  %s1658_s0 = scalar_lea.sflag [#allocation9], %s1648_s18 }
0x12d3   : > { %2268 = dma.done.wait (!%p2059_p2), %s1658_s0, 32  }
0x12d4   : > { %2270 = vsyncadd (!%p2059_p2), %s1658_s0, 4294967264  ;;  %s2896_s28 = sld [smem:[#allocation16_spill]]  ;;  %s2897_s25 = smov %s2277_s26 }
0x12d5   : > { %s2898_s26 = smov %s2281_s27  ;;  %s2899_s27 = smov %s2455_s20 }
0x12da   : > { %p31_p5 = scmp.ge.s32.totalorder %s2896_s28, 4  }
0x12dc   :  { %33 = sbr.rel (!%p31_p5) target bundleno = 16 (0x10), region = 142 }
0x12e3   :  { %1663 = vsyncpa [#allocation3], 1 }
0x12e4   :  { %1665 = vsyncpa [#allocation3 + $0x1], 1 }
0x12e5   :  { %1666 = vsyncpa [#allocation6], 1 }
0x12e6   :  { %1667 = vsyncpa [#allocation4], 1 }
0x12e7   :  { %1669 = vsyncpa [#allocation4 + $0x1], 1 }
0x12e8   :  { %1670 = vsyncpa [#allocation9], 1 }
0x12e9   :  { %1672 = vsyncpa [#allocation9 + $0x1], 1 }

</bundles_post_ra>
